<compile_context>
chip_gen: v7x
topology: tpu7x:2x2x1
jax: 0.10.0
libtpu: 0.0.40
codegen_flags: <defaults>
</compile_context>

<pallas_src>
import math

import jax
import jax.numpy as jnp
from jax.experimental import pallas as pl
from jax.experimental.pallas import tpu as pltpu


def _round_up(x, m):
    return ((x + m - 1) // m) * m


# ---------------------------------------------------------------------------
# Tiled matmul + bias (nn.Linear)
# ---------------------------------------------------------------------------

def _matmul_bias_kernel(a_ref, b_ref, bias_ref, o_ref, acc_ref):
    @pl.when(pl.program_id(2) == 0)
    def _():
        acc_ref[...] = jnp.zeros_like(acc_ref)

    acc_ref[...] += jnp.dot(a_ref[...], b_ref[...],
                            preferred_element_type=jnp.float32)

    @pl.when(pl.program_id(2) == pl.num_programs(2) - 1)
    def _():
        o_ref[...] = (acc_ref[...] + bias_ref[...]).astype(o_ref.dtype)


def pallas_matmul_bias(a, b, bias):
    """o = a @ b + bias.  a:(M,K), b:(K,N), bias:(N,).  bf16 on MXU, f32 accum."""
    M, K = a.shape
    K2, N = b.shape
    assert K == K2
    Kp = _round_up(K, 128)
    Np = _round_up(N, 128)
    tm = min(256, _round_up(M, 16))
    Mp = _round_up(M, tm)
    # Big weight tiles: with tiny M the kernel is pure weight streaming, so take
    # the whole padded N and up to 1024 of K per step (few grid steps, big DMAs,
    # unmasked lane-dense stores).  Worst case VMEM ~9 MiB (double-buffered).
    tn = next(t for t in (2048, 1024, 512, 256, 128) if Np % t == 0)
    tk = next(t for t in (1024, 512, 256, 128) if Kp % t == 0)

    a_p = jnp.pad(a.astype(jnp.bfloat16), ((0, Mp - M), (0, Kp - K)))
    b_p = jnp.pad(b.astype(jnp.bfloat16), ((0, Kp - K), (0, Np - N)))
    bias_p = jnp.pad(bias.astype(jnp.float32), (0, Np - N)).reshape(1, Np)

    out = pl.pallas_call(
        _matmul_bias_kernel,
        out_shape=jax.ShapeDtypeStruct((Mp, Np), jnp.float32),
        grid=(Mp // tm, Np // tn, Kp // tk),
        in_specs=[
            pl.BlockSpec((tm, tk), lambda i, j, k: (i, k)),
            pl.BlockSpec((tk, tn), lambda i, j, k: (k, j)),
            pl.BlockSpec((1, tn), lambda i, j, k: (0, j)),
        ],
        out_specs=pl.BlockSpec((tm, tn), lambda i, j, k: (i, j)),
        scratch_shapes=[pltpu.VMEM((tm, tn), jnp.float32)],
        compiler_params=pltpu.CompilerParams(
            dimension_semantics=("parallel", "parallel", "arbitrary"),
            vmem_limit_bytes=32 * 1024 * 1024),      # <= v7x 64 MiB physical
        cost_estimate=pl.CostEstimate(
            flops=2 * Mp * Np * Kp,
            transcendentals=0,
            bytes_accessed=Mp * Kp * 2 + Kp * Np * 2 + Mp * Np * 4 + Np * 4),
    )(a_p, b_p, bias_p)
    return out[:M, :N]


# ---------------------------------------------------------------------------
# Conv2d (stride 1, symmetric "same" padding) as per-tap shifted matmuls.
# For tiny Cin (conv1) the taps are folded into K host-side (mini im2col).
# ---------------------------------------------------------------------------

def _make_conv_tap_kernel(T, shifts, Mout):
    def kernel(x_ref, w_ref, b_ref, o_ref):
        s0 = shifts[0]
        acc = jnp.dot(x_ref[0, s0:s0 + Mout, :], w_ref[0],
                      preferred_element_type=jnp.float32)
        for t in range(1, T):
            s = shifts[t]
            acc = acc + jnp.dot(x_ref[0, s:s + Mout, :], w_ref[t],
                                preferred_element_type=jnp.float32)
        o_ref[0] = acc + b_ref[...]
    return kernel


def conv2d_nchw(x, layer):
    kh, kw, pad = layer["kh"], layer["kw"], layer["pad"]
    Cin, Cout = layer["cin"], layer["cout"]
    Cp, Coutp = layer["cp"], layer["coutp"]
    N, Cx, H, W = x.shape
    assert Cx == Cin
    Hp, Wp = H + 2 * pad, W + 2 * pad
    Ho, Wo = Hp - kh + 1, Wp - kw + 1
    T = kh * kw
    Mout = Ho * Wp                      # stride-1 rows over the padded width grid
    shifts_all = tuple(ky * Wp + kx for ky in range(kh) for kx in range(kw))

    x_nhwc = jnp.transpose(x.astype(jnp.float32), (0, 2, 3, 1))
    xp = jnp.pad(x_nhwc, ((0, 0), (pad, pad), (pad, pad), (0, 0)))

    if layer["fold"]:
        # Mini im2col for tiny Cin: fold the kh*kw taps into K (27 -> 128) so a
        # single matmul replaces T matmuls each at 3/128 K-utilization.
        xflat = jnp.pad(xp.reshape(N, Hp * Wp, Cin), ((0, 0), (0, kw), (0, 0)))
        slabs = [xflat[:, s:s + Mout, :] for s in shifts_all]
        xcols = jnp.concatenate(slabs, axis=-1)          # (N, Mout, T*Cin)
        Min = _round_up(Mout, 8)
        xf = jnp.pad(xcols, ((0, 0), (0, Min - Mout), (0, Cp - T * Cin)))
        T_k, shifts = 1, (0,)
    else:
        xq = jnp.pad(xp, ((0, 0), (0, 0), (0, 0), (0, Cp - Cin)))
        Min = _round_up(Hp * Wp + kw, 8)
        xf = jnp.pad(xq.reshape(N, Hp * Wp, Cp),
                     ((0, 0), (0, Min - Hp * Wp), (0, 0)))
        T_k, shifts = T, shifts_all
    xf = xf.astype(jnp.bfloat16)        # cast once in the wrapper (half the DMA)

    tn = 256 if Coutp % 256 == 0 else 128     # 256x256 MXU on v6e/v7x
    out = pl.pallas_call(
        _make_conv_tap_kernel(T_k, shifts, Mout),
        out_shape=jax.ShapeDtypeStruct((N, Mout, Coutp), jnp.float32),
        # (Cout tiles, batch): inner batch axis keeps the tap weights VMEM-resident.
        grid=(Coutp // tn, N),
        in_specs=[
            pl.BlockSpec((1, Min, Cp), lambda j, n: (n, 0, 0)),
            pl.BlockSpec((T_k, Cp, tn), lambda j, n: (0, 0, j)),
            pl.BlockSpec((1, tn), lambda j, n: (0, j)),
        ],
        out_specs=pl.BlockSpec((1, Mout, tn), lambda j, n: (n, 0, j)),
        compiler_params=pltpu.CompilerParams(
            dimension_semantics=("parallel", "parallel"),
            vmem_limit_bytes=32 * 1024 * 1024),
        cost_estimate=pl.CostEstimate(
            flops=2 * N * Mout * Coutp * T_k * Cp,
            transcendentals=0,
            bytes_accessed=N * Min * Cp * 2 + T_k * Cp * Coutp * 2
                           + N * Mout * Coutp * 4),
    )(xf, layer["w_kern"], layer["b_pad"])

    out = out.reshape(N, Ho, Wp, Coutp)[:, :, :Wo, :Cout]
    return jnp.transpose(out, (0, 3, 1, 2))


# ---------------------------------------------------------------------------
# BatchNorm2d (training-mode batch statistics)
# ---------------------------------------------------------------------------

def _bn_train_kernel(x_ref, g_ref, b_ref, o_ref):
    x = x_ref[...]
    inv_m = 1.0 / x.shape[0]
    mean = jnp.sum(x, axis=0, keepdims=True) * inv_m
    d = x - mean
    var = jnp.sum(d * d, axis=0, keepdims=True) * inv_m      # two-pass variance
    scale = g_ref[...] * jax.lax.rsqrt(var + 1e-5)
    o_ref[...] = d * scale + b_ref[...]


def batchnorm2d(x, layer):
    # TODO(synk): training-mode batch statistics only; nn.BatchNorm2d running
    # mean/var buffers are not tracked or updated here.
    gamma, beta = layer["gamma"], layer["beta"]
    N, C, H, W = x.shape
    Cp = _round_up(C, 128)
    M = N * H * W
    x2 = jnp.transpose(x.astype(jnp.float32), (0, 2, 3, 1)).reshape(M, C)
    x2 = jnp.pad(x2, ((0, 0), (0, Cp - C)))
    g = jnp.pad(gamma.astype(jnp.float32), (0, Cp - C),
                constant_values=1.0).reshape(1, Cp)
    b = jnp.pad(beta.astype(jnp.float32), (0, Cp - C)).reshape(1, Cp)

    tc = 128   # per-channel stats are independent -> parallel channel-column grid
    y = pl.pallas_call(
        _bn_train_kernel,
        out_shape=jax.ShapeDtypeStruct((M, Cp), jnp.float32),
        grid=(Cp // tc,),
        in_specs=[
            pl.BlockSpec((M, tc), lambda j: (0, j)),
            pl.BlockSpec((1, tc), lambda j: (0, j)),
            pl.BlockSpec((1, tc), lambda j: (0, j)),
        ],
        out_specs=pl.BlockSpec((M, tc), lambda j: (0, j)),
        compiler_params=pltpu.CompilerParams(dimension_semantics=("parallel",)),
    )(x2, g, b)
    y = y[:, :C].reshape(N, H, W, C)
    return jnp.transpose(y, (0, 3, 1, 2))


# ---------------------------------------------------------------------------
# MaxPool2d 3x3 / stride 2 / pad 1
# ---------------------------------------------------------------------------

def _make_pool_kernel(shifts, Mout):
    def kernel(x_ref, o_ref):
        r = x_ref[0, shifts[0]:shifts[0] + Mout, :]
        for s in shifts[1:]:
            r = jnp.maximum(r, x_ref[0, s:s + Mout, :])
        o_ref[0] = r
    return kernel


def maxpool_3x3_s2_p1(x):
    # TODO(synk): stride-2 decimation is done by an XLA slice after the kernel;
    # in-kernel row/column decimation would need strided VMEM reads.
    N, C, H, W = x.shape
    Ho = (H - 1) // 2 + 1
    Wo = (W - 1) // 2 + 1
    Cp = _round_up(C, 128)
    Hp, Wp = H + 2, W + 2
    Mout = H * Wp                            # stride-1 pooled rows; strided later
    Min = _round_up(Mout + 2 * Wp + 2, 8)

    x_nhwc = jnp.transpose(x.astype(jnp.float32), (0, 2, 3, 1))
    xp = jnp.pad(x_nhwc, ((0, 0), (1, 1), (1, 1), (0, Cp - C)),
                 constant_values=-jnp.inf)
    xf = jnp.pad(xp.reshape(N, Hp * Wp, Cp),
                 ((0, 0), (0, Min - Hp * Wp), (0, 0)),
                 constant_values=-jnp.inf)

    shifts = tuple(ky * Wp + kx for ky in range(3) for kx in range(3))
    out = pl.pallas_call(
        _make_pool_kernel(shifts, Mout),
        out_shape=jax.ShapeDtypeStruct((N, Mout, Cp), jnp.float32),
        grid=(N,),
        in_specs=[pl.BlockSpec((1, Min, Cp), lambda n: (n, 0, 0))],
        out_specs=pl.BlockSpec((1, Mout, Cp), lambda n: (n, 0, 0)),
        compiler_params=pltpu.CompilerParams(dimension_semantics=("parallel",)),
    )(xf)

    out = out.reshape(N, H, Wp, Cp)[:, 0::2, 0::2, :][:, :Ho, :Wo, :C]
    return jnp.transpose(out, (0, 3, 1, 2))


# ---------------------------------------------------------------------------
# Dropout (training mode) — keep-mask generated host-side with jax.random
# (no pltpu.prng_* so the kernel also lowers under interpret mode).
# ---------------------------------------------------------------------------

def _make_dropout_kernel(p):
    keep_prob = 1.0 - p
    inv_keep = 1.0 / keep_prob

    def kernel(x_ref, u_ref, o_ref):
        keep = u_ref[...] < keep_prob
        o_ref[...] = jnp.where(keep, x_ref[...] * inv_keep, 0.0)
    return kernel


def pallas_dropout(x, key, p=0.5):
    # TODO(synk): Bernoulli(1-p) keep mask + 1/(1-p) scaling matches nn.Dropout
    # (training mode) but not PyTorch's exact random stream; the per-layer key is
    # fixed so the mask repeats across calls.
    M, K = x.shape
    Mp = _round_up(M, 8)
    Kp = _round_up(K, 128)
    xp = jnp.pad(x.astype(jnp.float32), ((0, Mp - M), (0, Kp - K)))
    u = jax.random.uniform(key, (Mp, Kp), jnp.float32)

    tk = Kp // 2 if (Kp >= 256 and (Kp // 2) % 128 == 0) else Kp
    out = pl.pallas_call(
        _make_dropout_kernel(p),
        out_shape=jax.ShapeDtypeStruct((Mp, Kp), jnp.float32),
        grid=(Kp // tk,),
        in_specs=[pl.BlockSpec((Mp, tk), lambda j: (0, j)),
                  pl.BlockSpec((Mp, tk), lambda j: (0, j))],
        out_specs=pl.BlockSpec((Mp, tk), lambda j: (0, j)),
        compiler_params=pltpu.CompilerParams(dimension_semantics=("parallel",)),
    )(xp, u)
    return out[:M, :K]


# ---------------------------------------------------------------------------
# The model (mirrors the torch AlexNet.features indexing)
# ---------------------------------------------------------------------------

class AlexNetPallas:
    """forward(x, partition) applies layer `partition` of the features list,
    exactly mirroring AlexNet.forward in the PyTorch module (NCHW f32 I/O).
    Note: the source PyTorch Sequential contains no ReLU layers."""

    def __init__(self, num_classes=10, key=jax.random.PRNGKey(42)):
        ks = jax.random.split(key, 16)

        def conv_layer(k, cin, cout, ksz, pad):
            fan_out = cout * ksz * ksz        # kaiming_normal_, fan_out, relu gain
            std = math.sqrt(2.0 / fan_out)
            w = jax.random.normal(k, (cout, cin, ksz, ksz), jnp.float32) * std
            b = jnp.zeros((cout,), jnp.float32)
            coutp = _round_up(cout, 128)
            T = ksz * ksz
            # (Cout,Cin,kh,kw) -> (kh*kw, Cin, Cout) once at init.
            w_taps = jnp.transpose(w, (2, 3, 1, 0)).reshape(T, cin, cout)
            fold = T * cin <= 128              # conv1: fold taps into K
            if fold:
                cp = _round_up(T * cin, 128)
                wk = w_taps.reshape(T * cin, cout)
                wk = jnp.pad(wk, ((0, cp - T * cin), (0, coutp - cout)))
                w_kern = wk.reshape(1, cp, coutp).astype(jnp.bfloat16)
            else:
                cp = _round_up(cin, 128)
                wk = jnp.pad(w_taps, ((0, 0), (0, cp - cin), (0, coutp - cout)))
                w_kern = wk.astype(jnp.bfloat16)
            return ("conv", dict(w_kern=w_kern, w_ref=w_taps, b=b,
                                 b_pad=jnp.pad(b, (0, coutp - cout)).reshape(1, coutp),
                                 kh=ksz, kw=ksz, pad=pad, fold=fold,
                                 cin=cin, cout=cout, cp=cp, coutp=coutp))

        def bn_layer(c):
            return ("bn", dict(gamma=jnp.ones((c,), jnp.float32),
                               beta=jnp.zeros((c,), jnp.float32)))

        def linear_layer(k, in_f, out_f):
            w = jax.random.normal(k, (out_f, in_f), jnp.float32) * 0.01
            # pre-transpose to (in, out) + bf16 once at init (no per-call w.T copy)
            return ("linear", dict(w_t=jnp.transpose(w).astype(jnp.bfloat16),
                                   b=jnp.zeros((out_f,), jnp.float32)))

        self.layers = [
            conv_layer(ks[0], 3, 96, 3, 1),       # 0
            bn_layer(96),                         # 1
            ("maxpool", {}),                      # 2
            conv_layer(ks[3], 96, 256, 5, 2),     # 3
            bn_layer(256),                        # 4
            ("maxpool", {}),                      # 5
            conv_layer(ks[6], 256, 384, 3, 1),    # 6
            conv_layer(ks[7], 384, 384, 3, 1),    # 7
            conv_layer(ks[8], 384, 256, 3, 1),    # 8
            bn_layer(256),                        # 9
            ("maxpool", {}),                      # 10
            linear_layer(ks[11], 4 * 4 * 256, 2048),             # 11
            ("dropout", dict(key=jax.random.PRNGKey(12), p=0.5)),  # 12
            linear_layer(ks[13], 2048, 1024),                     # 13
            ("dropout", dict(key=jax.random.PRNGKey(14), p=0.5)),  # 14
            linear_layer(ks[15], 1024, num_classes),              # 15
        ]

    def forward(self, x, partition=0):
        kind, params = self.layers[partition]
        if kind == "conv":
            return conv2d_nchw(x, params)
        if kind == "bn":
            return batchnorm2d(x, params)
        if kind == "maxpool":
            return maxpool_3x3_s2_p1(x)
        if kind == "linear":
            return pallas_matmul_bias(x, params["w_t"], params["b"])
        if kind == "dropout":
            return pallas_dropout(x, params["key"], params["p"])
        raise ValueError(kind)


# ---------------------------------------------------------------------------
# Pure-JAX references (used only for demo-time sanity checks)
# ---------------------------------------------------------------------------

def _ref_conv(x, layer):
    kh, kw, pad = layer["kh"], layer["kw"], layer["pad"]
    w = layer["w_ref"].astype(jnp.bfloat16).astype(jnp.float32)   # (T, Cin, Cout)
    b = layer["b"]
    xb = x.astype(jnp.bfloat16).astype(jnp.float32)
    xp = jnp.pad(xb, ((0, 0), (0, 0), (pad, pad), (pad, pad)))
    N, C, H, W = x.shape
    Ho, Wo = H + 2 * pad - kh + 1, W + 2 * pad - kw + 1
    acc = jnp.zeros((N, layer["cout"], Ho, Wo), jnp.float32)
    t = 0
    for ky in range(kh):
        for kx in range(kw):
            patch = xp[:, :, ky:ky + Ho, kx:kx + Wo]
            acc = acc + jnp.einsum("nchw,cd->ndhw", patch, w[t],
                                   precision=jax.lax.Precision.HIGHEST)
            t += 1
    return acc + b[None, :, None, None]


def _ref_bn(x, layer):
    mean = jnp.mean(x, axis=(0, 2, 3), keepdims=True)
    var = jnp.mean(jnp.square(x - mean), axis=(0, 2, 3), keepdims=True)
    g = layer["gamma"][None, :, None, None]
    b = layer["beta"][None, :, None, None]
    return (x - mean) * jax.lax.rsqrt(var + 1e-5) * g + b


def _ref_pool(x):
    N, C, H, W = x.shape
    Ho, Wo = (H - 1) // 2 + 1, (W - 1) // 2 + 1
    xp = jnp.pad(x, ((0, 0), (0, 0), (1, 1), (1, 1)), constant_values=-jnp.inf)
    r = None
    for ky in range(3):
        for kx in range(3):
            win = xp[:, :, ky:ky + 2 * (Ho - 1) + 1:2, kx:kx + 2 * (Wo - 1) + 1:2]
            r = win if r is None else jnp.maximum(r, win)
    return r


def _ref_linear(x, layer):
    xb = x.astype(jnp.bfloat16).astype(jnp.float32)
    w = layer["w_t"].astype(jnp.float32)
    return jnp.dot(xb, w, precision=jax.lax.Precision.HIGHEST) + layer["b"]


# ---------------------------------------------------------------------------
# demo
# ---------------------------------------------------------------------------

if __name__ == "__main__":
    key = jax.random.PRNGKey(0)
    kx, kf, kc = jax.random.split(key, 3)
    x = jax.random.normal(kx, (2, 3, 16, 16), jnp.float32)

    model = AlexNetPallas(num_classes=10)

    # features path: conv1 -> bn1 -> pool1 -> conv2
    y0 = jax.block_until_ready(model.forward(x, 0))
    assert y0.shape == (2, 96, 16, 16), y0.shape
    assert bool(jnp.allclose(y0, _ref_conv(x, model.layers[0][1]),
                             rtol=2e-2, atol=2e-3))

    y1 = jax.block_until_ready(model.forward(y0, 1))
    assert y1.shape == (2, 96, 16, 16)
    assert bool(jnp.allclose(y1, _ref_bn(y0, model.layers[1][1]),
                             rtol=1e-3, atol=1e-3))

    y2 = jax.block_until_ready(model.forward(y1, 2))
    assert y2.shape == (2, 96, 8, 8)
    assert bool(jnp.allclose(y2, _ref_pool(y1), rtol=1e-6, atol=1e-6))

    y3 = jax.block_until_ready(model.forward(y2, 3))
    assert y3.shape == (2, 256, 8, 8)
    assert bool(jnp.allclose(y3, _ref_conv(y2, model.layers[3][1]),
                             rtol=2e-2, atol=2e-3))

    # a deep conv (Cin=256 -> Cout=384) at its native feature-map size
    x6 = jax.random.normal(kc, (2, 256, 4, 4), jnp.float32)
    y6 = jax.block_until_ready(model.forward(x6, 6))
    assert y6.shape == (2, 384, 4, 4)
    assert bool(jnp.allclose(y6, _ref_conv(x6, model.layers[6][1]),
                             rtol=3e-2, atol=3e-2))

    # classifier path (synthetic flat input at the nn.Linear(4*4*256, 2048) size)
    xf = jax.random.normal(kf, (2, 4 * 4 * 256), jnp.float32)
    z0 = jax.block_until_ready(model.forward(xf, 11))        # Linear 4096 -> 2048
    assert z0.shape == (2, 2048)
    assert bool(jnp.allclose(z0, _ref_linear(xf, model.layers[11][1]),
                             rtol=5e-2, atol=5e-2))

    z1 = jax.block_until_ready(model.forward(z0, 12))        # Dropout(p=0.5)
    assert z1.shape == (2, 2048)
    zero_frac = float(jnp.mean(z1 == 0.0))
    assert 0.35 < zero_frac < 0.65, zero_frac

    z2 = jax.block_until_ready(model.forward(z1, 13))        # Linear 2048 -> 1024
    z3 = jax.block_until_ready(model.forward(z2, 15))        # Linear 1024 -> 10
    assert z2.shape == (2, 1024) and z3.shape == (2, 10)

    print("KERNEL_OK")
</pallas_src>

<mosaic_0001>
module attributes {stable_mosaic.version = 11 : i64} {
  func.func @kernel(%arg0: i32, %arg1: i32, %arg2: memref<1x288x128xbf16, #tpu.memory_space<vmem>>, %arg3: memref<1x128x128xbf16, #tpu.memory_space<vmem>>, %arg4: memref<1x128xf32, #tpu.memory_space<vmem>>, %arg5: memref<1x288x128xf32, #tpu.memory_space<vmem>>) attributes {dimension_semantics = [#tpu.dimension_semantics<parallel>, #tpu.dimension_semantics<parallel>], iteration_bounds = array<i64: 1, 2>, scalar_prefetch = 0 : i64, scratch_operands = 0 : i64, tpu.core_type = #tpu.core_type<tc>, window_params = [{transform_indices = @transform_0, window_bounds = array<i64: 1, 288, 128>}, {transform_indices = @transform_1, window_bounds = array<i64: 1, 128, 128>}, {transform_indices = @transform_2, window_bounds = array<i64: 1, 128>}, {transform_indices = @transform_3, window_bounds = array<i64: 1, 288, 128>}]} {
    %c0 = arith.constant 0 : index
    %c0_0 = arith.constant 0 : index
    %c0_1 = arith.constant 0 : index
    %0 = vector.load %arg2[%c0, %c0_0, %c0_1] : memref<1x288x128xbf16, #tpu.memory_space<vmem>>, vector<1x288x128xbf16>
    %1 = vector.shape_cast %0 : vector<1x288x128xbf16> to vector<288x128xbf16>
    %c0_2 = arith.constant 0 : index
    %c0_3 = arith.constant 0 : index
    %c0_4 = arith.constant 0 : index
    %2 = vector.load %arg3[%c0_2, %c0_3, %c0_4] : memref<1x128x128xbf16, #tpu.memory_space<vmem>>, vector<1x128x128xbf16>
    %3 = vector.shape_cast %2 : vector<1x128x128xbf16> to vector<128x128xbf16>
    %cst = arith.constant dense<0.000000e+00> : vector<288x128xf32>
    %4 = tpu.matmul %1, %3, %cst {dimension_numbers = #tpu.dot_dimension_numbers<[1], [0], [0], [1], [0, 0, 1, 1], [], []>} : vector<288x128xbf16>, vector<128x128xbf16>, vector<288x128xf32> -> vector<288x128xf32>
    %c0_5 = arith.constant 0 : index
    %c0_6 = arith.constant 0 : index
    %5 = vector.load %arg4[%c0_5, %c0_6] : memref<1x128xf32, #tpu.memory_space<vmem>>, vector<1x128xf32>
    %6 = vector.broadcast %5 : vector<1x128xf32> to vector<288x128xf32>
    %7 = arith.addf %4, %6 : vector<288x128xf32>
    %c0_7 = arith.constant 0 : index
    %c0_8 = arith.constant 0 : index
    %c0_9 = arith.constant 0 : index
    %8 = vector.load %arg5[%c0_7, %c0_8, %c0_9] : memref<1x288x128xf32, #tpu.memory_space<vmem>>, vector<1x288x128xf32>
    %9 = vector.shape_cast %8 : vector<1x288x128xf32> to vector<288x128xf32>
    %10 = vector.shape_cast %7 : vector<288x128xf32> to vector<1x288x128xf32>
    tpu.vector_store %arg5[%c0_7, %c0_8, %c0_9], %10 {strides = array<i32>} : memref<1x288x128xf32, #tpu.memory_space<vmem>>, vector<1x288x128xf32>,
    return
  }
  func.func @transform_0(%arg0: i32, %arg1: i32) -> (i32, i32, i32) {
    %c0_i32 = arith.constant 0 : i32
    %c0_i32_0 = arith.constant 0 : i32
    %c0_i32_1 = arith.constant 0 : i32
    return %arg1, %c0_i32, %c0_i32_0 : i32, i32, i32
  }
  func.func @transform_1(%arg0: i32, %arg1: i32) -> (i32, i32, i32) {
    %c0_i32 = arith.constant 0 : i32
    %c0_i32_0 = arith.constant 0 : i32
    %c0_i32_1 = arith.constant 0 : i32
    return %c0_i32, %c0_i32_0, %arg0 : i32, i32, i32
  }
  func.func @transform_2(%arg0: i32, %arg1: i32) -> (i32, i32) {
    %c0_i32 = arith.constant 0 : i32
    %c0_i32_0 = arith.constant 0 : i32
    return %c0_i32, %arg0 : i32, i32
  }
  func.func @transform_3(%arg0: i32, %arg1: i32) -> (i32, i32, i32) {
    %c0_i32 = arith.constant 0 : i32
    %c0_i32_0 = arith.constant 0 : i32
    return %arg1, %c0_i32, %arg0 : i32, i32, i32
  }
}

</mosaic_0001>

<bundles_post_ra>
// kernel: tpu_custom_call.1
= control target key start
LH: loop header
LB: loop body
LE: loop exit
PB: predicated region body
PF: predicated region fallthrough
CT: control target
= control target key end

     0   :  { %8 = vsyncpa [#allocation3], 0  ;;  %s1524_s0 = inlined_call_operand.hbm [shape: bf16[2,288,128], index: 0, kind: input, shape index: {}]   ;;  %s1525_s1 = inlined_call_operand.hbm [shape: bf16[1,128,128], index: 1, kind: input, shape index: {}]   ;;  %s1526_s2 = inlined_call_operand.vmem [shape: f32[1,128], index: 2, kind: input, shape index: {}]   ;;  %s1527_s3 = inlined_call_operand.hbm [shape: f32[2,288,128], index: 3, kind: output, shape index: {}]  }
   0x1   :  { %10 = vsyncpa [#allocation3 + $0x1], 0 }
   0x2   :  { %11 = vsyncpa [#allocation6], 0 }
   0x3   :  { %12 = vsyncpa [#allocation4], 0 }
   0x4   :  { %14 = vsyncpa [#allocation4 + $0x1], 0  ;;  %s1204_s12 = smov 0   ;;  %s1206_s13 = smov 0  }
   0x5   :  { %s1208_s14 = smov 0   ;;  %s1210_s15 = smov 0  }
   0x6   :  { %s1212_s16 = smov 0   ;;  %s1214_s17 = smov 0  }
   0x7 LB: > { %s790_s18 = sadd.s32 4294967295, %s1175_s17   ;;  %s791_s19 = sadd.s32 4294967294, %s1175_s17   ;;  %s1175_s17 = sphi %s1214_s17, %s20_s17   ;;  %s1171_s16 = sphi %s1212_s16, %s1550_s16   ;;  %s1167_s15 = sphi %s1210_s15, %s1549_s15   ;;  %s1163_s14 = sphi %s1208_s14, %s1548_s14   ;;  %s1159_s13 = sphi %s1206_s13, %s1547_s13   ;;  %s1155_s12 = sphi %s1204_s12, %s1546_s12  }
   0x8   : > { %p52_p0 = scmp.ne.s32.totalorder %s1159_s13, %s1155_s12  ;;  %p1238_p1 = scmp.eq.s32.totalorder %s790_s18, 0 }
   0x9   : > { %p1242_p2 = scmp.eq.s32.totalorder %s790_s18, 1  ;;  %p136_p3 = scmp.eq.s32.totalorder %s791_s19, 1 }
   0xa   : > { %s1532_s20 = scalar_select %p1238_p1, 1, 0 }
   0xb   : > { %s1533_s21 = scalar_select %p1242_p2, 1, 0 }
   0xc   : > { %p1248_p4 = por %p1238_p1, %p52_p0  ;;  %p792_p5 = scmp.ge.s32.totalorder %s1175_s17, 1 }
   0xd   : > { %p1253_p6 = por %p136_p3, %p52_p0  ;;  %p143_p7 = scmp.lt.s32.totalorder %s1175_s17, 3 }
   0xe   : > { %s1534_s22 = scalar_select %p1248_p4, 1, 0 }
   0xf   : > { %s1535_s23 = scalar_select %p1253_p6, 1, 0 }
  0x10   : > { %p1258_p8 = pnand %p792_p5, %p143_p7  ;;  %s1177_s25 = smov [#allocation5]  }
  0x11   : > { %s157_s26 = sshll.u32 %s1177_s25, 4  ;;  %s29_s28 = sadd.s32 1, %s1171_s16  ;;  %s158_s26 = int_to_ptr.vmem [resolvable:$true] %s157_s26 }
  0x12   : > { %s1536_s24 = scalar_select %p1258_p8, 1, 0 }
  0x13   : > { %p936_p9 = pneg %p1258_p8  ;;  %s1031_s4 = scalar_lea.hbm %s1525_s1, 1024 }
  0x14   : > { %p1032_p12 = scmp.ne.s32.totalorder %s1525_s1, %s1031_s4  ;;  %p1038_p5 = scmp.lt.u32.totalorder %s1031_s4, %s1525_s1 }
  0x15   : > { %p1267_p11 = pnand %p936_p9, %p1238_p1 }
  0x17   : > { %p1033_p13 = pneg %p1267_p11 }
  0x19   : > { %p1034_p0 = pnand %p1033_p13, %p1032_p12 }
  0x1b   : > { %p1035_p3 = pneg %p1034_p0 }
  0x1d   : > { %p1040_p7 = pnand %p1038_p5, %p1035_p3 }
  0x1f   : > { %1043 = shalt.err (!%p1040_p7)
}
  0x20   : > { %s1044_s9 = scalar_lea.vmem %s158_s26, 1024  ;;  %p1052_p1 = scmp.lt.s32.totalorder %s158_s26, %s158_s26 }
  0x21   : > { %p1045_p9 = scmp.ne.s32.totalorder %s158_s26, %s1044_s9  ;;  %p1053_p4 = scmp.lt.s32.totalorder %s1044_s9, %s1044_s9 }
  0x23   : > { %p1047_p10 = pnand %p1045_p9, %p1033_p13  ;;  %p1054_p8 = por %p1053_p4, %p1052_p1 }
  0x25   : > { %p1048_p6 = pneg %p1047_p10 }
  0x27   : > { %p1055_p2 = pnand %p1054_p8, %p1048_p6 }
  0x29   : > { %1058 = shalt.err (!%p1055_p2)
}
  0x2a   : > { %s1178_s10 = smov 64   ;;  %s1179_s11 = smov 4  }
  0x2b   : > { %939 = dma.hbm_to_vmem [thread:$0]  (!%p1267_p11), %s1525_s1, 1024, %s158_s26, [#allocation6], %s1178_s10, %s1178_s10, %s1179_s11  }
  0x2c   : > { %p30_p1 = scmp.ge.s32.totalorder %s29_s28, 2  ;;  %s39_s25 = sadd.s32 1, %s1163_s14 }
  0x2d   : > { %p46_p2 = scmp.ne.s32.totalorder %s1163_s14, %s1159_s13  ;;  %p47_p4 = scmp.eq.s32.totalorder %s1175_s17, 0 }
  0x2e   : > { %s1552_s28 = smov (%p30_p1, %s29_s28), 0  ;;  %p1538_p8 = scmp.ne.s32.totalorder %s1533_s21, 0 }
  0x2f   : > { %p48_p6 = por %p47_p4, %p46_p2  ;;  %s36_s27 = ssub.s32 %s1171_s16, %s1552_s28 }
  0x30   : > { %p1299_p10 = por %p1538_p8, %p46_p2  ;;  %p949_p12 = scmp.lt.s32.totalorder %s1175_s17, 2 }
  0x31   : > { %p37_p13 = scmp.eq.s32.totalorder %s36_s27, 0  ;;  %s177_s30 = sand.u32 1, %s1163_s14  }
  0x32   : > { %s923_s4 = smul.u32 144, %s177_s30  ;;  %p1311_p11 = pnand %p949_p12, %p48_p6 }
  0x33   : > { %s1308_s5 = scalar_select %p37_p13, %s1163_s14, %s39_s25  }
  0x34   : > { %s924_s26 = smul.u32 2304, %s1171_s16  ;;  %s181_s6 = scalar_lea.vmem [#allocation2], %s923_s4 }
  0x35   : > { %s188_s7 = sshll.u32 %s181_s6, 4  ;;  %s1322_s19 = scalar_lea.sflag [#allocation3], %s177_s30  ;;  %s1320_s7 = int_to_ptr.vmem [resolvable:$true] %s188_s7 }
  0x36   : > { %s1318_s18 = scalar_lea.hbm %s1524_s0, %s924_s26  ;;  %p1061_p3 = pneg %p1311_p11 }
  0x37   : > { %s1059_s25 = scalar_lea.hbm %s1318_s18, 2304  ;;  %s1064_s26 = scalar_lea.hbm %s1524_s0, 4608 }
  0x38   : > { %p1060_p0 = scmp.ne.s32.totalorder %s1318_s18, %s1059_s25  ;;  %p1065_p9 = scmp.lt.u32.totalorder %s1318_s18, %s1524_s0 }
  0x39   : > { %p1066_p1 = scmp.lt.u32.totalorder %s1064_s26, %s1059_s25  ;;  %p1068_p4 = scmp.lt.u32.totalorder %s1059_s25, %s1318_s18 }
  0x3a   : > { %p1062_p5 = pnand %p1061_p3, %p1060_p0 }
  0x3b   : > { %p1067_p2 = por %p1066_p1, %p1065_p9 }
  0x3c   : > { %p1063_p7 = pneg %p1062_p5 }
  0x3d   : > { %p1069_p6 = por %p1068_p4, %p1067_p2 }
  0x3f   : > { %p1070_p8 = pnand %p1069_p6, %p1063_p7 }
  0x41   : > { %1073 = shalt.err (!%p1070_p8)
}
  0x42   : > { %s1074_s30 = scalar_lea.vmem %s1320_s7, 2304  ;;  %s1180_s21 = smov [#allocation2]  }
  0x43   : > { %p1075_p12 = scmp.ne.s32.totalorder %s1320_s7, %s1074_s30  ;;  %s1079_s27 = sshll.u32 %s1180_s21, 4  ;;  %s1080_s27 = int_to_ptr.vmem [resolvable:$false] %s1079_s27 }
  0x44   : > { %s1081_s4 = scalar_lea.vmem %s1080_s27, 4608  ;;  %p1082_p5 = scmp.lt.s32.totalorder %s1320_s7, %s1080_s27 }
  0x45   : > { %p1077_p13 = pnand %p1075_p12, %p1061_p3  ;;  %p1083_p9 = scmp.lt.s32.totalorder %s1081_s4, %s1074_s30 }
  0x47   : > { %p1078_p0 = pneg %p1077_p13  ;;  %p1084_p1 = por %p1083_p9, %p1082_p5 }
  0x49   : > { %p1085_p2 = pnand %p1084_p1, %p1078_p0 }
  0x4b   : > { %1088 = shalt.err (!%p1085_p2)
}
  0x4c   : > { %943 = dma.hbm_to_vmem [thread:$0]  (!%p1311_p11), %s1318_s18, 2304, %s1320_s7, %s1322_s19, %s1178_s10, %s1178_s10, %s1179_s11  }
  0x4d   : > { %p1541_p3 = scmp.ne.s32.totalorder %s1536_s24, 0 }
  0x4e   : > { %s1356_s25 = sand.u32 (!%p1541_p3), 1, %s1159_s13   ;;  %p1542_p7 = scmp.ne.s32.totalorder (!%p1541_p3), %s1534_s22, 0 }
  0x4f   : > { %200 = sbr.rel (%p1541_p3) target bundleno = 387 (0x183), region = 32  ;;  %s203_s6 = scalar_lea.sflag (!%p1541_p3), [#allocation3], %s1356_s25 }
  0x50   : > { %s925_s26 = smul.u32 (!%p1541_p3), 144, %s1356_s25 }
  0x52   : > { %s1360_s9 = scalar_lea.vmem (!%p1541_p3), [#allocation2], %s925_s26 }
  0x56   : > { %1142 = dma.done.wait (%p1542_p7), %s203_s6, 2304  }
  0x57   : > { %1144 = vsyncadd (%p1542_p7), %s203_s6, 4294964992  ;;  %p1543_p11 = scmp.ne.s32.totalorder %s1532_s20, 0 }
  0x59   : > { %1146 = dma.done.wait (%p1543_p11), [#allocation6], 1024  }
  0x5a   : > { %1148 = vsyncadd (%p1543_p11), [#allocation6], 4294966272  ;;  %v1005_v0 = vld [vmem:[#allocation5] sm:$0xff]   ;;  %v1006_v1 = vld [vmem:[#allocation5 + $0x8] sm:$0xff]   ;;  %s926_s20 = smul.u32 288, %s1356_s25  ;;  %s1181_s21 = smov [#allocation7]  }
  0x5b   : > { %855 = vmatprep.subr.bf16.mxu0 %v1005_v0  ;;  %907 = vmatprep.subr.bf16.mxu1 %v1005_v0  ;;  %v1007_v2 = vld [vmem:[#allocation5 + $0x10] sm:$0xff]   ;;  %v1008_v3 = vld [vmem:[#allocation5 + $0x18] sm:$0xff]   ;;  %v1009_v6 = vld [vmem:[#allocation5 + $0x20] sm:$0xff]   ;;  %s927_s11 = smul.u32 4608, %s1167_s15  ;;  %s669_s15 = scalar_lea.sflag [#allocation4], %s1356_s25 }
  0x5c   : > { %856 = vmatpush3.bf16.msra.mxu0 %v1005_v0  ;;  %915 = vmatpush3.bf16.msra.mxu1 %v1005_v0  ;;  %v1013_v4 = vld [vmem:[%s1360_s9] sm:$0xff]   ;;  %v1015_v5 = vld [vmem:[%s1360_s9 + $0x50] sm:$0xff]   ;;  %v1010_v7 = vld [vmem:[#allocation5 + $0x28] sm:$0xff]   ;;  %s1398_s10 = scalar_lea.vmem [#allocation7], %s926_s20  ;;  %s1093_s27 = sshll.u32 %s1181_s21, 4  ;;  %s1094_s27 = int_to_ptr.vmem [resolvable:$false] %s1093_s27 }
  0x5d   : > { %857 = vmatprep.subr.bf16.mxu0 %v1006_v1  ;;  %908 = vmatprep.subr.bf16.mxu1 %v1006_v1  ;;  %v1011_v8 = vld [vmem:[#allocation5 + $0x30] sm:$0xff]   ;;  %v1012_v9 = vld [vmem:[#allocation5 + $0x38] sm:$0xff]   ;;  %v1392_v26 = vld [vmem:[%s1526_s2] ss:$0 sm:$0xff]  ;;  %s683_s7 = sshll.u32 %s1398_s10, 4  ;;  %s1469_s19 = scalar_lea.hbm %s1527_s3, %s927_s11  ;;  %s1471_s7 = int_to_ptr.vmem [resolvable:$true] %s683_s7 }
  0x5e   : > { %871 = vmatprep.mubr.bf16.mxu0 %v1013_v4  ;;  %891 = vmatprep.mubr.bf16.mxu1 %v1015_v5  ;;  %v1014_v10 = vld [vmem:[%s1360_s9 + $0x8] sm:$0xff]   ;;  %v1016_v11 = vld [vmem:[%s1360_s9 + $0x58] sm:$0xff]   ;;  %v1017_v12 = vld [vmem:[%s1360_s9 + $0x10] sm:$0xff]   ;;  %s1089_s30 = scalar_lea.vmem %s1471_s7, 4608  ;;  %s1095_s4 = scalar_lea.vmem %s1094_s27, 9216 }
  0x5f   : > { %v1019_v13 = vld [vmem:[%s1360_s9 + $0x60] sm:$0xff]   ;;  %v1018_v14 = vld [vmem:[%s1360_s9 + $0x18] sm:$0xff]   ;;  %v1020_v15 = vld [vmem:[%s1360_s9 + $0x68] sm:$0xff]   ;;  %p1090_p4 = scmp.ne.s32.totalorder %s1471_s7, %s1089_s30  ;;  %p1096_p12 = scmp.lt.s32.totalorder %s1471_s7, %s1094_s27 }
  0x60   : > { %858 = vmatpush3.bf16.msra.mxu0 %v1006_v1  ;;  %916 = vmatpush3.bf16.msra.mxu1 %v1006_v1  ;;  %v1021_v16 = vld [vmem:[%s1360_s9 + $0x20] sm:$0xff]   ;;  %v1023_v17 = vld [vmem:[%s1360_s9 + $0x70] sm:$0xff]   ;;  %v1022_v18 = vld [vmem:[%s1360_s9 + $0x28] sm:$0xff]   ;;  %p1097_p13 = scmp.lt.s32.totalorder %s1095_s4, %s1089_s30 }
  0x61   : > { %859 = vmatprep.subr.bf16.mxu0 %v1007_v2  ;;  %909 = vmatprep.subr.bf16.mxu1 %v1007_v2  ;;  %v1024_v19 = vld [vmem:[%s1360_s9 + $0x78] sm:$0xff]   ;;  %v1025_v20 = vld [vmem:[%s1360_s9 + $0x30] sm:$0xff]   ;;  %v1027_v21 = vld [vmem:[%s1360_s9 + $0x80] sm:$0xff]   ;;  %p1091_p6 = pnand %p1090_p4, %p1299_p10 }
  0x62   : > { %v1026_v22 = vld [vmem:[%s1360_s9 + $0x38] sm:$0xff]   ;;  %v1028_v23 = vld [vmem:[%s1360_s9 + $0x88] sm:$0xff]   ;;  %v1029_v24 = vld [vmem:[%s1360_s9 + $0x40] sm:$0xff]   ;;  %p1098_p0 = por %p1097_p13, %p1096_p12 }
  0x63   : > { %v1030_v25 = vld [vmem:[%s1360_s9 + $0x48] sm:$0xff]   ;;  %p1092_p8 = pneg %p1091_p6 }
  0x64   : > { %860 = vmatpush3.bf16.msra.mxu0 %v1007_v2  ;;  %917 = vmatpush3.bf16.msra.mxu1 %v1007_v2 }
  0x65   : > { %861 = vmatprep.subr.bf16.mxu0 %v1008_v3  ;;  %910 = vmatprep.subr.bf16.mxu1 %v1008_v3  ;;  %p1099_p5 = pnand %p1098_p0, %p1092_p8 }
  0x68   : > { %862 = vmatpush3.bf16.msra.mxu0 %v1008_v3  ;;  %918 = vmatpush3.bf16.msra.mxu1 %v1008_v3 }
  0x69   : > { %863 = vmatprep.subr.bf16.mxu0 %v1009_v6  ;;  %911 = vmatprep.subr.bf16.mxu1 %v1009_v6 }
  0x6c   : > { %864 = vmatpush3.bf16.msra.mxu0 %v1009_v6  ;;  %919 = vmatpush3.bf16.msra.mxu1 %v1009_v6 }
  0x6d   : > { %865 = vmatprep.subr.bf16.mxu0 %v1010_v7  ;;  %912 = vmatprep.subr.bf16.mxu1 %v1010_v7 }
  0x70   : > { %866 = vmatpush3.bf16.msra.mxu0 %v1010_v7  ;;  %920 = vmatpush3.bf16.msra.mxu1 %v1010_v7 }
  0x71   : > { %867 = vmatprep.subr.bf16.mxu0 %v1011_v8  ;;  %913 = vmatprep.subr.bf16.mxu1 %v1011_v8 }
  0x74   : > { %868 = vmatpush3.bf16.msra.mxu0 %v1011_v8  ;;  %921 = vmatpush3.bf16.msra.mxu1 %v1011_v8 }
  0x75   : > { %869 = vmatprep.subr.bf16.mxu0 %v1012_v9  ;;  %914 = vmatprep.subr.bf16.mxu1 %v1012_v9 }
  0x78   : > { %870 = vmatpush3.bf16.msra.mxu0 %v1012_v9  ;;  %922 = vmatpush3.bf16.msra.mxu1 %v1012_v9 }
  0x7b   : > { %872 = vmatmul.mubr.bf16.vlgmr.msra.gmra.mrb[0].mxu0 %v1014_v10  ;;  %892 = vmatmul.mubr.bf16.vlgmr.msra.gmra.mrb[0].mxu1 %v1016_v11 }
  0x7c   : > { %875 = vmatprep.mubr.bf16.mxu0 %v1017_v12  ;;  %895 = vmatprep.mubr.bf16.mxu1 %v1019_v13 }
  0x83   : > { %876 = vmatmul.mubr.bf16.gmra.mrb[4].mxu0 %v1018_v14  ;;  %896 = vmatmul.mubr.bf16.gmra.mrb[4].mxu1 %v1020_v15 }
  0x84   : > { %879 = vmatprep.mubr.bf16.mxu0 %v1021_v16  ;;  %899 = vmatprep.mubr.bf16.mxu1 %v1023_v17 }
  0x8b   : > { %880 = vmatmul.mubr.bf16.gmra.mrb[8].mxu0 %v1022_v18  ;;  %900 = vmatmul.mubr.bf16.gmra.mrb[8].mxu1 %v1024_v19 }
  0x8c   : > { %883 = vmatprep.mubr.bf16.mxu0 %v1025_v20  ;;  %903 = vmatprep.mubr.bf16.mxu1 %v1027_v21 }
  0x93   : > { %884 = vmatmul.mubr.bf16.gmra.mrb[12].mxu0 %v1026_v22  ;;  %904 = vmatmul.mubr.bf16.gmra.mrb[12].mxu1 %v1028_v23 }
  0x94   : > { %887 = vmatprep.mubr.bf16.mxu0 %v1029_v24 }
  0x9b   : > { %888 = vmatmul.mubr.bf16.gmra.mrb[16].mxu0 %v1030_v25 }
 0x14e   : > { %v873_v27 = vpop.f32.mrb[0].mxu0  ;;  %v893_v28 = vpop.f32.mrb[0].mxu1 }
 0x14f   : > { %v498_v29 = vadd.f32 %v873_v27, %v1392_v26  ;;  %v489_v30 = vpop.f32.mrb[1].mxu0  ;;  %v578_v31 = vadd.f32 %v893_v28, %v1392_v26  ;;  %v569_v32 = vpop.f32.mrb[1].mxu1 }
 0x150   : > { %v490_v33 = vadd.f32 %v1392_v26, %v489_v30  ;;  %v874_v34 = vpop.f32.mrb[2].mxu0  ;;  %v570_v35 = vadd.f32 %v1392_v26, %v569_v32  ;;  %v894_v36 = vpop.f32.mrb[2].mxu1 }
 0x151   : > { %634 = vst [vmem:[%s1398_s10 + $0x10] sm:$0xff] %v498_v29  ;;  %v501_v37 = vadd.f32 %v874_v34, %v1392_v26  ;;  %v492_v38 = vpop.f32.mrb[3].mxu0  ;;  %654 = vst [vmem:[%s1398_s10 + $0xb0] sm:$0xff] %v578_v31  ;;  %v581_v39 = vadd.f32 %v894_v36, %v1392_v26  ;;  %v572_v40 = vpop.f32.mrb[3].mxu1 }
 0x152   : > { %632 = vst [vmem:[%s1398_s10] sm:$0xff] %v490_v33  ;;  %v493_v41 = vadd.f32 %v1392_v26, %v492_v38  ;;  %652 = vst [vmem:[%s1398_s10 + $0xa0] sm:$0xff] %v570_v35  ;;  %v573_v42 = vadd.f32 %v1392_v26, %v572_v40 }
 0x153   : > { %635 = vst [vmem:[%s1398_s10 + $0x18] sm:$0xff] %v501_v37  ;;  %655 = vst [vmem:[%s1398_s10 + $0xb8] sm:$0xff] %v581_v39 }
 0x154   : > { %633 = vst [vmem:[%s1398_s10 + $0x8] sm:$0xff] %v493_v41  ;;  %653 = vst [vmem:[%s1398_s10 + $0xa8] sm:$0xff] %v573_v42 }
 0x156   : > { %v877_v43 = vpop.f32.mrb[4].mxu0  ;;  %v897_v44 = vpop.f32.mrb[4].mxu1 }
 0x157   : > { %v514_v45 = vadd.f32 %v877_v43, %v1392_v26  ;;  %v505_v46 = vpop.f32.mrb[5].mxu0  ;;  %v594_v47 = vadd.f32 %v897_v44, %v1392_v26  ;;  %v585_v48 = vpop.f32.mrb[5].mxu1 }
 0x158   : > { %v506_v49 = vadd.f32 %v1392_v26, %v505_v46  ;;  %v878_v50 = vpop.f32.mrb[6].mxu0  ;;  %v586_v51 = vadd.f32 %v1392_v26, %v585_v48  ;;  %v898_v52 = vpop.f32.mrb[6].mxu1 }
 0x159   : > { %638 = vst [vmem:[%s1398_s10 + $0x30] sm:$0xff] %v514_v45  ;;  %v517_v53 = vadd.f32 %v878_v50, %v1392_v26  ;;  %v508_v54 = vpop.f32.mrb[7].mxu0  ;;  %658 = vst [vmem:[%s1398_s10 + $0xd0] sm:$0xff] %v594_v47  ;;  %v597_v55 = vadd.f32 %v898_v52, %v1392_v26  ;;  %v588_v56 = vpop.f32.mrb[7].mxu1 }
 0x15a   : > { %636 = vst [vmem:[%s1398_s10 + $0x20] sm:$0xff] %v506_v49  ;;  %v509_v57 = vadd.f32 %v1392_v26, %v508_v54  ;;  %656 = vst [vmem:[%s1398_s10 + $0xc0] sm:$0xff] %v586_v51  ;;  %v589_v58 = vadd.f32 %v1392_v26, %v588_v56 }
 0x15b   : > { %639 = vst [vmem:[%s1398_s10 + $0x38] sm:$0xff] %v517_v53  ;;  %659 = vst [vmem:[%s1398_s10 + $0xd8] sm:$0xff] %v597_v55 }
 0x15c   : > { %637 = vst [vmem:[%s1398_s10 + $0x28] sm:$0xff] %v509_v57  ;;  %657 = vst [vmem:[%s1398_s10 + $0xc8] sm:$0xff] %v589_v58 }
 0x15e   : > { %v881_v59 = vpop.f32.mrb[8].mxu0  ;;  %v901_v60 = vpop.f32.mrb[8].mxu1 }
 0x15f   : > { %v530_v61 = vadd.f32 %v881_v59, %v1392_v26  ;;  %v521_v62 = vpop.f32.mrb[9].mxu0  ;;  %v610_v63 = vadd.f32 %v901_v60, %v1392_v26  ;;  %v601_v0 = vpop.f32.mrb[9].mxu1 }
 0x160   : > { %v522_v1 = vadd.f32 %v1392_v26, %v521_v62  ;;  %v882_v2 = vpop.f32.mrb[10].mxu0  ;;  %v602_v3 = vadd.f32 %v1392_v26, %v601_v0  ;;  %v902_v4 = vpop.f32.mrb[10].mxu1 }
 0x161   : > { %642 = vst [vmem:[%s1398_s10 + $0x50] sm:$0xff] %v530_v61  ;;  %v533_v5 = vadd.f32 %v882_v2, %v1392_v26  ;;  %v524_v6 = vpop.f32.mrb[11].mxu0  ;;  %662 = vst [vmem:[%s1398_s10 + $0xf0] sm:$0xff] %v610_v63  ;;  %v613_v7 = vadd.f32 %v902_v4, %v1392_v26  ;;  %v604_v8 = vpop.f32.mrb[11].mxu1 }
 0x162   : > { %640 = vst [vmem:[%s1398_s10 + $0x40] sm:$0xff] %v522_v1  ;;  %v525_v9 = vadd.f32 %v1392_v26, %v524_v6  ;;  %660 = vst [vmem:[%s1398_s10 + $0xe0] sm:$0xff] %v602_v3  ;;  %v605_v10 = vadd.f32 %v1392_v26, %v604_v8 }
 0x163   : > { %643 = vst [vmem:[%s1398_s10 + $0x58] sm:$0xff] %v533_v5  ;;  %663 = vst [vmem:[%s1398_s10 + $0xf8] sm:$0xff] %v613_v7 }
 0x164   : > { %641 = vst [vmem:[%s1398_s10 + $0x48] sm:$0xff] %v525_v9  ;;  %661 = vst [vmem:[%s1398_s10 + $0xe8] sm:$0xff] %v605_v10 }
 0x166   : > { %v885_v11 = vpop.f32.mrb[12].mxu0  ;;  %v905_v12 = vpop.f32.mrb[12].mxu1 }
 0x167   : > { %v546_v13 = vadd.f32 %v885_v11, %v1392_v26  ;;  %v537_v14 = vpop.f32.mrb[13].mxu0  ;;  %v626_v15 = vadd.f32 %v905_v12, %v1392_v26  ;;  %v617_v16 = vpop.f32.mrb[13].mxu1 }
 0x168   : > { %v538_v17 = vadd.f32 %v1392_v26, %v537_v14  ;;  %v886_v18 = vpop.f32.mrb[14].mxu0  ;;  %v618_v19 = vadd.f32 %v1392_v26, %v617_v16  ;;  %v906_v20 = vpop.f32.mrb[14].mxu1 }
 0x169   : > { %646 = vst [vmem:[%s1398_s10 + $0x70] sm:$0xff] %v546_v13  ;;  %v549_v21 = vadd.f32 %v886_v18, %v1392_v26  ;;  %v540_v22 = vpop.f32.mrb[15].mxu0  ;;  %666 = vst [vmem:[%s1398_s10 + $0x110] sm:$0xff] %v626_v15  ;;  %v629_v23 = vadd.f32 %v906_v20, %v1392_v26  ;;  %v620_v24 = vpop.f32.mrb[15].mxu1 }
 0x16a   : > { %644 = vst [vmem:[%s1398_s10 + $0x60] sm:$0xff] %v538_v17  ;;  %v541_v25 = vadd.f32 %v1392_v26, %v540_v22  ;;  %664 = vst [vmem:[%s1398_s10 + $0x100] sm:$0xff] %v618_v19  ;;  %v621_v27 = vadd.f32 %v1392_v26, %v620_v24 }
 0x16b   : > { %647 = vst [vmem:[%s1398_s10 + $0x78] sm:$0xff] %v549_v21  ;;  %667 = vst [vmem:[%s1398_s10 + $0x118] sm:$0xff] %v629_v23 }
 0x16c   : > { %645 = vst [vmem:[%s1398_s10 + $0x68] sm:$0xff] %v541_v25  ;;  %665 = vst [vmem:[%s1398_s10 + $0x108] sm:$0xff] %v621_v27 }
 0x16e   : > { %v889_v28 = vpop.f32.mrb[16].mxu0 }
 0x16f   : > { %v562_v29 = vadd.f32 %v889_v28, %v1392_v26  ;;  %v553_v30 = vpop.f32.mrb[17].mxu0 }
 0x170   : > { %v554_v31 = vadd.f32 %v1392_v26, %v553_v30  ;;  %v890_v32 = vpop.f32.mrb[18].mxu0 }
 0x171   : > { %650 = vst [vmem:[%s1398_s10 + $0x90] sm:$0xff] %v562_v29  ;;  %v565_v33 = vadd.f32 %v890_v32, %v1392_v26  ;;  %v556_v34 = vpop.f32.mrb[19].mxu0 }
 0x172   : > { %648 = vst [vmem:[%s1398_s10 + $0x80] sm:$0xff] %v554_v31  ;;  %v557_v35 = vadd.f32 %v1392_v26, %v556_v34 }
 0x173   : > { %651 = vst [vmem:[%s1398_s10 + $0x98] sm:$0xff] %v565_v33 }
 0x174   : > { %649 = vst [vmem:[%s1398_s10 + $0x88] sm:$0xff] %v557_v35 }
 0x175   : > { %1102 = shalt.err (!%p1099_p5)
}
 0x176   : > { %s1103_s26 = scalar_lea.hbm %s1469_s19, 4608  ;;  %s1107_s20 = scalar_lea.hbm %s1527_s3, 9216 }
 0x177   : > { %p1104_p9 = scmp.ne.s32.totalorder %s1469_s19, %s1103_s26  ;;  %p1108_p3 = scmp.lt.u32.totalorder %s1469_s19, %s1527_s3 }
 0x178   : > { %p1109_p7 = scmp.lt.u32.totalorder %s1107_s20, %s1103_s26  ;;  %p1111_p4 = scmp.lt.u32.totalorder %s1103_s26, %s1469_s19 }
 0x179   : > { %p1105_p1 = pnand %p1104_p9, %p1299_p10 }
 0x17a   : > { %p1110_p11 = por %p1109_p7, %p1108_p3 }
 0x17b   : > { %p1106_p2 = pneg %p1105_p1 }
 0x17c   : > { %p1112_p6 = por %p1111_p4, %p1110_p11 }
 0x17e   : > { %p1113_p8 = pnand %p1112_p6, %p1106_p2 }
 0x180   : > { %1116 = shalt.err (!%p1113_p8)
}
 0x181   : > { %s1182_s10 = smov 128   ;;  %s1183_s11 = smov 8  }
 0x182   : > { %934 = dma.vmem_to_hbm [thread:$0]  (%p1299_p10), %s1471_s7, 4608, %s1469_s19, %s669_s15, %s1182_s10, %s1182_s10, %s1183_s11  }
 0x183 PF: > { %s698_s8 = sand.u32 1, %s1155_s12   ;;  %p1544_p12 = scmp.ne.s32.totalorder %s1535_s23, 0 }
 0x184   : > { %p1545_p13 = scmp.ge.s32.totalorder %s1175_s17, 2  ;;  %s699_s18 = scalar_lea.sflag [#allocation4], %s698_s8 }
 0x186   : > { %p945_p0 = pnand %p1545_p13, %p1544_p12 }
 0x188   : > { %1150 = dma.done.wait (!%p945_p0), %s699_s18, 4608  }
 0x189   : > { %1152 = vsyncadd (!%p945_p0), %s699_s18, 4294962688  ;;  %s20_s17 = sadd.s32 1, %s1175_s17   ;;  %s1546_s12 = smov %s1159_s13 }
 0x18a   : > { %p17_p5 = scmp.ge.s32.totalorder %s20_s17, 4   ;;  %s1547_s13 = smov %s1163_s14 }
 0x18b   : > { %s1548_s14 = smov %s1308_s5  ;;  %s1549_s15 = smov %s1171_s16 }
 0x18c   : > { %s1550_s16 = smov %s1552_s28  ;;  %19 = sbr.rel (!%p17_p5) target bundleno = 7 (0x7), region = 85 }
 0x193   :  { %704 = vsyncpa [#allocation3], 1 }
 0x194   :  { %706 = vsyncpa [#allocation3 + $0x1], 1 }
 0x195   :  { %707 = vsyncpa [#allocation6], 1 }
 0x196   :  { %708 = vsyncpa [#allocation4], 1 }
 0x197   :  { %710 = vsyncpa [#allocation4 + $0x1], 1 }

</bundles_post_ra>
